<compile_context>
chip_gen: v5e
topology: v5e:2x2
jax: 0.10.0
libtpu: 0.0.40
codegen_flags: <defaults>
</compile_context>

<pallas_src>
import jax
import jax.numpy as jnp
from jax.experimental import pallas as pl
from jax.experimental.pallas import tpu as pltpu


def _round_up(x, m):
    return ((x + m - 1) // m) * m


# ---------------------------------------------------------------------------
# Kernel
# ---------------------------------------------------------------------------
def _make_soft_q_kernel(has_action, obs_dim, n_critics):
    """Build the fused MLP kernel.  Weights carry a leading critic axis of size
    n_critics; a static Python loop unrolls over it so fused SAC twin critics share
    one launch and one activation DMA stream."""

    def kernel(*refs):
        if has_action:
            (x_ref, a_ref, w0_ref, b0_ref, w1_ref, b1_ref, w2_ref, b2_ref,
             out_ref, xa_ref) = refs
            # Assemble the concatenated [x | a] tile once in VMEM so layer 0 is a
            # single K=(obs+act) dot instead of two tiny-K dots (halves layer-0
            # MXU passes vs. the previous W0x/W0a split).
            xa_ref[:, :obs_dim] = x_ref[...]
            xa_ref[:, obs_dim:] = a_ref[...]
            xa = xa_ref[...]
        else:
            (x_ref, w0_ref, b0_ref, w1_ref, b1_ref, w2_ref, b2_ref, out_ref) = refs
            xa = x_ref[...]

        w_dtype = w1_ref.dtype
        for c in range(n_critics):                                   # static unroll
            h0 = jnp.dot(xa, w0_ref[c], preferred_element_type=jnp.float32)
            h0 = jnp.maximum(h0 + b0_ref[c], 0.0)                    # bias+ReLU in f32 (VPU)
            # Cast activations back to the weight dtype so bf16 params actually hit
            # the bf16 MXU path; accumulation stays f32.
            h1 = jnp.dot(h0.astype(w_dtype), w1_ref[c],
                         preferred_element_type=jnp.float32)
            h1 = jnp.maximum(h1 + b1_ref[c], 0.0)
            q = jnp.dot(h1.astype(w_dtype), w2_ref[c],
                        preferred_element_type=jnp.float32)          # [tb, 1]
            out_ref[c] = (q + b2_ref[c]).astype(out_ref.dtype)       # b2 scalar from SMEM

    return kernel


# ---------------------------------------------------------------------------
# One-time parameter preparation (hoisted out of the forward path)
# ---------------------------------------------------------------------------
def prepare_params(params, param_dtype=jnp.float32):
    """params: a dict of PyTorch-convention tensors (single critic) or a list/tuple of
    such dicts (fused critics, e.g. SAC's twin Q-networks).  Weights are transposed to
    [in, out], stacked along a leading critic axis and cast to param_dtype (bf16 is
    supported for MXU throughput; biases stay f32).  Call once, reuse per forward."""
    if isinstance(params, dict):
        params = (params,)

    def stack(name):
        return jnp.stack([jnp.asarray(p[name]) for p in params])

    return {
        "w0": jnp.swapaxes(stack("fc0_w"), 1, 2).astype(param_dtype),  # [C, obs+act, H]
        "b0": stack("fc0_b")[:, None, :].astype(jnp.float32),          # [C, 1, H]
        "w1": jnp.swapaxes(stack("fc1_w"), 1, 2).astype(param_dtype),  # [C, H, H]
        "b1": stack("fc1_b")[:, None, :].astype(jnp.float32),          # [C, 1, H]
        "w2": jnp.swapaxes(stack("fc2_w"), 1, 2).astype(param_dtype),  # [C, H, 1]
        "b2": stack("fc2_b")[:, 0].astype(jnp.float32),                # [C]  (SMEM)
    }


# ---------------------------------------------------------------------------
# Forward
# ---------------------------------------------------------------------------
def soft_q_forward(prepped, x, a=None, *, block_b=2048):
    """Pallas-backed SoftQNetwork.forward.

    prepped: output of prepare_params(); x: [B, obs] (or [B, obs+act] if a is None);
    a: optional [B, act].  Returns [B, C] float32 Q-values (C = number of fused
    critics; C == 1 matches the module's [B, 1])."""
    w0 = prepped["w0"]
    n_critics, d_in, hidden = w0.shape
    compute_dtype = w0.dtype
    dtype_bytes = jnp.dtype(compute_dtype).itemsize
    B = x.shape[0]

    if a is not None:
        obs_dim, act_dim = x.shape[1], a.shape[1]
        assert obs_dim + act_dim == d_in, (obs_dim, act_dim, d_in)
        a = a.astype(compute_dtype)
    else:
        obs_dim, act_dim = x.shape[1], 0
        assert obs_dim == d_in, (obs_dim, d_in)
    x = x.astype(compute_dtype)

    # Batch tile: sublane-aligned (16 rows for packed bf16, 8 for f32).  2048 rows
    # amortize the ~0.35us per-grid-step overhead while the working set stays at a
    # few MiB.  Pallas masks the partial last block, so no wrapper-side padding.
    align = 16 if dtype_bytes < 4 else 8
    tb = min(_round_up(block_b, align), _round_up(B, align))
    if pl.cdiv(B, tb) < 2 and B >= 2048:
        # Keep >=2 grid blocks for large batches so ("parallel",) can shard the batch
        # across v7x's two TensorCores (no-op on single-TC v5e/v6e).
        tb = _round_up(pl.cdiv(B, 2), align)
    grid = (pl.cdiv(B, tb),)

    def resident(arr):
        # Whole-array block, same block every grid step -> stays VMEM-resident.
        zeros = (0,) * arr.ndim
        return pl.BlockSpec(arr.shape, lambda i: zeros)

    smem_spec = pl.BlockSpec(memory_space=pltpu.MemorySpace.SMEM)   # per-critic b2 scalars

    kernel = _make_soft_q_kernel(a is not None, obs_dim, n_critics)

    if a is not None:
        operands = (x, a, prepped["w0"], prepped["b0"], prepped["w1"],
                    prepped["b1"], prepped["w2"], prepped["b2"])
        in_specs = [
            pl.BlockSpec((tb, obs_dim), lambda i: (i, 0)),   # x tile, pipelined
            pl.BlockSpec((tb, act_dim), lambda i: (i, 0)),   # a tile, pipelined
            resident(prepped["w0"]), resident(prepped["b0"]),
            resident(prepped["w1"]), resident(prepped["b1"]),
            resident(prepped["w2"]), smem_spec,
        ]
        scratch_shapes = [pltpu.VMEM((tb, d_in), compute_dtype)]    # assembled [x | a] tile
    else:
        operands = (x, prepped["w0"], prepped["b0"], prepped["w1"],
                    prepped["b1"], prepped["w2"], prepped["b2"])
        in_specs = [
            pl.BlockSpec((tb, d_in), lambda i: (i, 0)),
            resident(prepped["w0"]), resident(prepped["b0"]),
            resident(prepped["w1"]), resident(prepped["b1"]),
            resident(prepped["w2"]), smem_spec,
        ]
        scratch_shapes = []

    # Advisory cost estimate (bias bytes counted exactly per review).
    n_weight = n_critics * (d_in * hidden + hidden * hidden + hidden)
    flops = 2 * B * n_critics * hidden * (d_in + hidden + 1)
    bytes_accessed = (dtype_bytes * (B * d_in + n_weight)
                      + 4 * n_critics * (2 * hidden + 1) + 4 * B * n_critics)
    cost = pl.CostEstimate(flops=flops, transcendentals=0,
                           bytes_accessed=int(bytes_accessed))

    # VMEM budget: lane-padded, double-buffered activation/output tiles + resident
    # weights (2 pipeline buffers each) + the xa scratch + f32 h0/h1 temporaries.
    lane = lambda n: _round_up(max(n, 1), 128)
    act_bufs = 2 * tb * (lane(obs_dim) + (lane(act_dim) if a is not None else 0)) * dtype_bytes
    out_bufs = 2 * n_critics * tb * lane(1) * 4
    w_bytes = (n_critics * (_round_up(d_in, 8) * hidden + hidden * hidden
                            + hidden * lane(1)) * dtype_bytes
               + n_critics * 2 * lane(hidden) * 4)
    scratch_bytes = (tb * lane(d_in) * dtype_bytes) if a is not None else 0
    interm = 3 * tb * lane(hidden) * 4
    vmem_est = act_bufs + out_bufs + 2 * w_bytes + scratch_bytes + interm
    try:
        vmem_cap = pltpu.get_tpu_info().vmem_capacity_bytes   # 64 MiB v7x, 128 MiB v5e/v6e
    except Exception:
        vmem_cap = 64 << 20                                   # conservative (v7x) fallback
    vmem_limit = int(min(int(0.75 * vmem_cap), max(16 << 20, 2 * vmem_est)))

    out = pl.pallas_call(
        kernel,
        out_shape=jax.ShapeDtypeStruct((n_critics, B, 1), jnp.float32),
        grid=grid,
        in_specs=in_specs,
        out_specs=pl.BlockSpec((n_critics, tb, 1), lambda i: (0, i, 0)),
        scratch_shapes=scratch_shapes,
        compiler_params=pltpu.CompilerParams(
            dimension_semantics=("parallel",),
            vmem_limit_bytes=vmem_limit,
        ),
        cost_estimate=cost,
    )(*operands)

    # TODO(synk): emit a lane-dense (1, tb)-transposed q tile instead of (tb, 1) to avoid
    # 1-lane masked stores on the writeback path (modest win; output bytes are tiny).
    return jnp.transpose(out[:, :, 0])   # [B, C]; C == 1 -> [B, 1] as in the module


# ---------------------------------------------------------------------------
# Synthetic init + pure-JAX reference + self-test
# ---------------------------------------------------------------------------
def init_params(key, obs_dim, action_dim, hidden_dim=256):
    """Deterministic synthetic init (PyTorch nn.Linear shape conventions)."""
    keys = jax.random.split(key, 6)
    d_in = obs_dim + action_dim

    def unif(k, shape, fan_in):
        bound = 1.0 / jnp.sqrt(fan_in)
        return jax.random.uniform(k, shape, jnp.float32, -bound, bound)

    return {
        "fc0_w": unif(keys[0], (hidden_dim, d_in), d_in),
        "fc0_b": unif(keys[1], (hidden_dim,), d_in),
        "fc1_w": unif(keys[2], (hidden_dim, hidden_dim), hidden_dim),
        "fc1_b": unif(keys[3], (hidden_dim,), hidden_dim),
        "fc2_w": unif(keys[4], (1, hidden_dim), hidden_dim),
        "fc2_b": unif(keys[5], (1,), hidden_dim),
    }


def _reference_forward(params, x, a=None):
    xa = jnp.concatenate([x, a], axis=1) if a is not None else x
    h0 = jnp.maximum(xa @ params["fc0_w"].T + params["fc0_b"], 0.0)
    h1 = jnp.maximum(h0 @ params["fc1_w"].T + params["fc1_b"], 0.0)
    return h1 @ params["fc2_w"].T + params["fc2_b"]


if __name__ == "__main__":
    key = jax.random.PRNGKey(0)
    k_p1, k_p2, k_x, k_a, k_xb, k_ab = jax.random.split(key, 6)

    batch, obs_dim, action_dim, hidden_dim = 4, 16, 8, 256   # module default hidden=256
    params = init_params(k_p1, obs_dim, action_dim, hidden_dim)
    params2 = init_params(k_p2, obs_dim, action_dim, hidden_dim)

    x = jax.random.normal(k_x, (batch, obs_dim), jnp.float32)
    a = jax.random.normal(k_a, (batch, action_dim), jnp.float32)

    prepped = prepare_params(params)                         # single critic, f32

    # 1) standard SAC critic call: forward(x, a)
    q = jax.block_until_ready(soft_q_forward(prepped, x, a))
    q_ref = _reference_forward(params, x, a)
    assert q.shape == (batch, 1), q.shape
    assert jnp.allclose(q, q_ref, atol=1e-5, rtol=1e-5), (q, q_ref)

    # 2) forward(x) where x already carries obs+action features (a=None path)
    xa = jnp.concatenate([x, a], axis=1)
    q2 = jax.block_until_ready(soft_q_forward(prepped, xa))
    q2_ref = _reference_forward(params, xa)
    assert q2.shape == (batch, 1), q2.shape
    assert jnp.allclose(q2, q2_ref, atol=1e-5, rtol=1e-5), (q2, q2_ref)

    # 3) larger batch not divisible by the tile: exercises the masked partial block
    big_b = 300
    xb = jax.random.normal(k_xb, (big_b, obs_dim), jnp.float32)
    ab = jax.random.normal(k_ab, (big_b, action_dim), jnp.float32)
    q3 = jax.block_until_ready(soft_q_forward(prepped, xb, ab, block_b=128))
    q3_ref = _reference_forward(params, xb, ab)
    assert q3.shape == (big_b, 1), q3.shape
    assert jnp.allclose(q3, q3_ref, atol=1e-4, rtol=1e-4)

    # 4) fused twin critics: one launch, one activation stream, two Q heads
    prepped_twin = prepare_params([params, params2])
    q_twin = jax.block_until_ready(soft_q_forward(prepped_twin, xb, ab))
    ref_twin = jnp.concatenate([_reference_forward(params, xb, ab),
                                _reference_forward(params2, xb, ab)], axis=1)
    assert q_twin.shape == (big_b, 2), q_twin.shape
    assert jnp.allclose(q_twin, ref_twin, atol=1e-4, rtol=1e-4)

    # 5) bf16 weight/activation fast path (f32 accumulation kept in-kernel)
    prepped_bf16 = prepare_params(params, param_dtype=jnp.bfloat16)
    q_bf = jax.block_until_ready(soft_q_forward(prepped_bf16, xb, ab))
    assert q_bf.shape == (big_b, 1), q_bf.shape
    assert jnp.allclose(q_bf, q3_ref, atol=1e-1, rtol=1e-1), \
        float(jnp.max(jnp.abs(q_bf - q3_ref)))

    print("KERNEL_OK")
</pallas_src>

<mosaic_0001>
module attributes {stable_mosaic.version = 11 : i64} {
  func.func @kernel(%arg0: i32, %arg1: memref<8x16xf32, #tpu.memory_space<vmem>>, %arg2: memref<8x8xf32, #tpu.memory_space<vmem>>, %arg3: memref<1x24x256xf32, #tpu.memory_space<vmem>>, %arg4: memref<1x1x256xf32, #tpu.memory_space<vmem>>, %arg5: memref<1x256x256xf32, #tpu.memory_space<vmem>>, %arg6: memref<1x1x256xf32, #tpu.memory_space<vmem>>, %arg7: memref<1x256x1xf32, #tpu.memory_space<vmem>>, %arg8: memref<1xf32, #tpu.memory_space<smem>>, %arg9: memref<1x8x1xf32, #tpu.memory_space<vmem>>, %arg10: memref<8x24xf32, #tpu.memory_space<vmem>>) attributes {dimension_semantics = [#tpu.dimension_semantics<parallel>], iteration_bounds = array<i64: 1>, scalar_prefetch = 0 : i64, scratch_operands = 1 : i64, tpu.core_type = #tpu.core_type<tc>, window_params = [{transform_indices = @transform_0, window_bounds = array<i64: 8, 16>}, {transform_indices = @transform_1, window_bounds = array<i64: 8, 8>}, {pipeline_mode = #tpu.pipeline_mode<synchronous>, transform_indices = @transform_2, window_bounds = array<i64: 1, 24, 256>}, {pipeline_mode = #tpu.pipeline_mode<synchronous>, transform_indices = @transform_3, window_bounds = array<i64: 1, 1, 256>}, {pipeline_mode = #tpu.pipeline_mode<synchronous>, transform_indices = @transform_4, window_bounds = array<i64: 1, 256, 256>}, {pipeline_mode = #tpu.pipeline_mode<synchronous>, transform_indices = @transform_5, window_bounds = array<i64: 1, 1, 256>}, {pipeline_mode = #tpu.pipeline_mode<synchronous>, transform_indices = @transform_6, window_bounds = array<i64: 1, 256, 1>}, {transform_indices = @transform_7, window_bounds = array<i64: 1>}, {transform_indices = @transform_8, window_bounds = array<i64: 1, 8, 1>}]} {
    %c0 = arith.constant 0 : index
    %c0_0 = arith.constant 0 : index
    %0 = vector.load %arg1[%c0, %c0_0] : memref<8x16xf32, #tpu.memory_space<vmem>>, vector<8x16xf32>
    %c0_1 = arith.constant 0 : index
    %c0_2 = arith.constant 0 : index
    %1 = vector.load %arg10[%c0_1, %c0_2] : memref<8x24xf32, #tpu.memory_space<vmem>>, vector<8x16xf32>
    tpu.vector_store %arg10[%c0_1, %c0_2], %0 {strides = array<i32>} : memref<8x24xf32, #tpu.memory_space<vmem>>, vector<8x16xf32>,
    %c0_3 = arith.constant 0 : index
    %c0_4 = arith.constant 0 : index
    %2 = vector.load %arg2[%c0_3, %c0_4] : memref<8x8xf32, #tpu.memory_space<vmem>>, vector<8x8xf32>
    %c0_5 = arith.constant 0 : index
    %c16 = arith.constant 16 : index
    %3 = vector.load %arg10[%c0_5, %c16] : memref<8x24xf32, #tpu.memory_space<vmem>>, vector<8x8xf32>
    tpu.vector_store %arg10[%c0_5, %c16], %2 {strides = array<i32>} : memref<8x24xf32, #tpu.memory_space<vmem>>, vector<8x8xf32>,
    %c0_6 = arith.constant 0 : index
    %c0_7 = arith.constant 0 : index
    %4 = vector.load %arg10[%c0_6, %c0_7] : memref<8x24xf32, #tpu.memory_space<vmem>>, vector<8x24xf32>
    %c0_8 = arith.constant 0 : index
    %c0_9 = arith.constant 0 : index
    %c0_10 = arith.constant 0 : index
    %5 = vector.load %arg3[%c0_8, %c0_9, %c0_10] : memref<1x24x256xf32, #tpu.memory_space<vmem>>, vector<1x24x256xf32>
    %6 = vector.shape_cast %5 : vector<1x24x256xf32> to vector<24x256xf32>
    %cst = arith.constant dense<0.000000e+00> : vector<8x256xf32>
    %7 = tpu.matmul %4, %6, %cst {dimension_numbers = #tpu.dot_dimension_numbers<[1], [0], [0], [1], [0, 0, 1, 1], [], []>} : vector<8x24xf32>, vector<24x256xf32>, vector<8x256xf32> -> vector<8x256xf32>
    %c0_11 = arith.constant 0 : index
    %c0_12 = arith.constant 0 : index
    %c0_13 = arith.constant 0 : index
    %8 = vector.load %arg4[%c0_11, %c0_12, %c0_13] : memref<1x1x256xf32, #tpu.memory_space<vmem>>, vector<1x1x256xf32>
    %9 = vector.shape_cast %8 : vector<1x1x256xf32> to vector<1x256xf32>
    %10 = vector.broadcast %9 : vector<1x256xf32> to vector<8x256xf32>
    %11 = arith.addf %7, %10 : vector<8x256xf32>
    %cst_14 = arith.constant 0.000000e+00 : f32
    %12 = vector.broadcast %cst_14 : f32 to vector<8x256xf32>
    %13 = arith.maximumf %11, %12 : vector<8x256xf32>
    %c0_15 = arith.constant 0 : index
    %c0_16 = arith.constant 0 : index
    %c0_17 = arith.constant 0 : index
    %14 = vector.load %arg5[%c0_15, %c0_16, %c0_17] : memref<1x256x256xf32, #tpu.memory_space<vmem>>, vector<1x256x256xf32>
    %15 = vector.shape_cast %14 : vector<1x256x256xf32> to vector<256x256xf32>
    %cst_18 = arith.constant dense<0.000000e+00> : vector<8x256xf32>
    %16 = tpu.matmul %13, %15, %cst_18 {dimension_numbers = #tpu.dot_dimension_numbers<[1], [0], [0], [1], [0, 0, 1, 1], [], []>} : vector<8x256xf32>, vector<256x256xf32>, vector<8x256xf32> -> vector<8x256xf32>
    %c0_19 = arith.constant 0 : index
    %c0_20 = arith.constant 0 : index
    %c0_21 = arith.constant 0 : index
    %17 = vector.load %arg6[%c0_19, %c0_20, %c0_21] : memref<1x1x256xf32, #tpu.memory_space<vmem>>, vector<1x1x256xf32>
    %18 = vector.shape_cast %17 : vector<1x1x256xf32> to vector<1x256xf32>
    %19 = vector.broadcast %18 : vector<1x256xf32> to vector<8x256xf32>
    %20 = arith.addf %16, %19 : vector<8x256xf32>
    %cst_22 = arith.constant 0.000000e+00 : f32
    %21 = vector.broadcast %cst_22 : f32 to vector<8x256xf32>
    %22 = arith.maximumf %20, %21 : vector<8x256xf32>
    %c0_23 = arith.constant 0 : index
    %c0_24 = arith.constant 0 : index
    %c0_25 = arith.constant 0 : index
    %23 = vector.load %arg7[%c0_23, %c0_24, %c0_25] : memref<1x256x1xf32, #tpu.memory_space<vmem>>, vector<1x256x1xf32>
    %24 = vector.shape_cast %23 : vector<1x256x1xf32> to vector<256x1xf32>
    %cst_26 = arith.constant dense<0.000000e+00> : vector<8x1xf32>
    %25 = tpu.matmul %22, %24, %cst_26 {dimension_numbers = #tpu.dot_dimension_numbers<[1], [0], [0], [1], [0, 0, 1, 1], [], []>} : vector<8x256xf32>, vector<256x1xf32>, vector<8x1xf32> -> vector<8x1xf32>
    %c0_27 = arith.constant 0 : index
    %26 = memref.load %arg8[%c0_27] : memref<1xf32, #tpu.memory_space<smem>>
    %27 = vector.broadcast %26 : f32 to vector<8x1xf32>
    %28 = arith.addf %25, %27 : vector<8x1xf32>
    %c0_28 = arith.constant 0 : index
    %c0_29 = arith.constant 0 : index
    %c0_30 = arith.constant 0 : index
    %29 = vector.load %arg9[%c0_28, %c0_29, %c0_30] : memref<1x8x1xf32, #tpu.memory_space<vmem>>, vector<1x8x1xf32>
    %30 = vector.shape_cast %29 : vector<1x8x1xf32> to vector<8x1xf32>
    %31 = vector.shape_cast %28 : vector<8x1xf32> to vector<1x8x1xf32>
    tpu.vector_store %arg9[%c0_28, %c0_29, %c0_30], %31 {strides = array<i32>} : memref<1x8x1xf32, #tpu.memory_space<vmem>>, vector<1x8x1xf32>,
    return
  }
  func.func @transform_0(%arg0: i32) -> (i32, i32) {
    %c0_i32 = arith.constant 0 : i32
    %c0_i32_0 = arith.constant 0 : i32
    return %arg0, %c0_i32 : i32, i32
  }
  func.func @transform_1(%arg0: i32) -> (i32, i32) {
    %c0_i32 = arith.constant 0 : i32
    %c0_i32_0 = arith.constant 0 : i32
    return %arg0, %c0_i32 : i32, i32
  }
  func.func @transform_2(%arg0: i32) -> (i32, i32, i32) {
    %c0_i32 = arith.constant 0 : i32
    %c0_i32_0 = arith.constant 0 : i32
    %c0_i32_1 = arith.constant 0 : i32
    %c0_i32_2 = arith.constant 0 : i32
    return %c0_i32, %c0_i32_0, %c0_i32_1 : i32, i32, i32
  }
  func.func @transform_3(%arg0: i32) -> (i32, i32, i32) {
    %c0_i32 = arith.constant 0 : i32
    %c0_i32_0 = arith.constant 0 : i32
    %c0_i32_1 = arith.constant 0 : i32
    %c0_i32_2 = arith.constant 0 : i32
    return %c0_i32, %c0_i32_0, %c0_i32_1 : i32, i32, i32
  }
  func.func @transform_4(%arg0: i32) -> (i32, i32, i32) {
    %c0_i32 = arith.constant 0 : i32
    %c0_i32_0 = arith.constant 0 : i32
    %c0_i32_1 = arith.constant 0 : i32
    %c0_i32_2 = arith.constant 0 : i32
    return %c0_i32, %c0_i32_0, %c0_i32_1 : i32, i32, i32
  }
  func.func @transform_5(%arg0: i32) -> (i32, i32, i32) {
    %c0_i32 = arith.constant 0 : i32
    %c0_i32_0 = arith.constant 0 : i32
    %c0_i32_1 = arith.constant 0 : i32
    %c0_i32_2 = arith.constant 0 : i32
    return %c0_i32, %c0_i32_0, %c0_i32_1 : i32, i32, i32
  }
  func.func @transform_6(%arg0: i32) -> (i32, i32, i32) {
    %c0_i32 = arith.constant 0 : i32
    %c0_i32_0 = arith.constant 0 : i32
    %c0_i32_1 = arith.constant 0 : i32
    %c0_i32_2 = arith.constant 0 : i32
    return %c0_i32, %c0_i32_0, %c0_i32_1 : i32, i32, i32
  }
  func.func @transform_7(%arg0: i32) -> i32 {
    %c0_i32 = arith.constant 0 : i32
    %c0_i32_0 = arith.constant 0 : i32
    return %c0_i32 : i32
  }
  func.func @transform_8(%arg0: i32) -> (i32, i32, i32) {
    %c0_i32 = arith.constant 0 : i32
    %c0_i32_0 = arith.constant 0 : i32
    %c0_i32_1 = arith.constant 0 : i32
    return %c0_i32, %arg0, %c0_i32_0 : i32, i32, i32
  }
}

</mosaic_0001>

<bundles_post_ra>
// kernel: tpu_custom_call.1
= control target key start
LH: loop header
LB: loop body
LE: loop exit
PB: predicated region body
PF: predicated region fallthrough
CT: control target
= control target key end

     0   :  { %14 = vsyncpa [#allocation5], 0  ;;  %s416_s30 = smov [#allocation4]   ;;  %s417_s10 = smov 256   ;;  %s599_s0 = inlined_call_operand.vmem [shape: f32[4,16], index: 0, kind: input, shape index: {}]   ;;  %s600_s1 = inlined_call_operand.vmem [shape: f32[4,8], index: 1, kind: input, shape index: {}]   ;;  %s601_s2 = inlined_call_operand.vmem [shape: f32[1,24,256], index: 2, kind: input, shape index: {}]   ;;  %s602_s3 = inlined_call_operand.vmem [shape: f32[1,1,256], index: 3, kind: input, shape index: {}]   ;;  %s603_s4 = inlined_call_operand.hbm [shape: f32[1,256,256], index: 4, kind: input, shape index: {}]   ;;  %s604_s5 = inlined_call_operand.vmem [shape: f32[1,1,256], index: 5, kind: input, shape index: {}]   ;;  %s605_s6 = inlined_call_operand.vmem [shape: f32[1,256,1], index: 6, kind: input, shape index: {}]   ;;  %s606_s7 = inlined_call_operand.<no memory space> [shape: f32[1], index: 7, kind: input, shape index: {}]   ;;  %s607_s8 = inlined_call_operand.vmem [shape: f32[1,4,1], index: 8, kind: output, shape index: {}]  }
   0x1   :  { %s27_s29 = sshll.u32 %s603_s4, 4  ;;  %s29_s9 = sshll.u32 %s416_s30, 4  ;;  %s28_s29 = int_to_ptr.hbm [resolvable:$true] %s27_s29  ;;  %s30_s9 = int_to_ptr.vmem [resolvable:$true] %s29_s9 }
   0x2   :  { %s418_s11 = smov 16  }
   0x3   :  { %35 = dma.hbm_to_vmem [thread:$0]  %s28_s29, 8192, %s30_s9, [#allocation5], %s417_s10, %s417_s10, %s418_s11  }
   0x4   :  { %414 = dma.done.wait [#allocation5], 8192  }
   0x5   :  { %415 = vsyncadd [#allocation5], 4294959104  ;;  %vm47_vm0 = vcmask 130048   ;;  %v49_v0 = vld [vmem:[%s600_s1] sm:$0xff]  ;;  %v62_v3 = vld [vmem:[%s601_s2 + $0x28] sm:$0xff]  ;;  %vm54_vm1 = vcmask 195712  }
   0x6   :  { %v46_v1 = vld [vmem:[%s599_s0] sm:$0xff]  ;;  %51 = vrot.lane.b32.xlu0 %v49_v0, %s418_s11  ;;  %v59_v4 = vld [vmem:[%s601_s2 + $0x10] sm:$0xff]  ;;  %106 = vmatpush.msra.mxu1 %v62_v3  ;;  %v60_v5 = vld [vmem:[%s601_s2 + $0x18] sm:$0xff]  ;;  %vm69_vm2 = vcmask 195584   ;;  %vm341_vm3 = vcmask 7168  }
   0x7   :  { %48 = vst.msk [vmem:[#allocation2] sm:$0xff] %vm47_vm0, %v46_v1  ;;  %v61_v2 = vld [vmem:[%s601_s2 + $0x20] sm:$0xff]  ;;  %v58_v7 = vld [vmem:[%s601_s2 + $0x8] sm:$0xff]  ;;  %v145_v8 = vld [vmem:[#allocation4 + $0xf0] sm:$0xff] }
   0x8   :  { %86 = vmatpush.msra.mxu0 %v61_v2  ;;  %v57_v6 = vld [vmem:[%s601_s2] sm:$0xff]  ;;  %107 = vmatpush.msra.mxu1 %v60_v5  ;;  %v177_v9 = vld [vmem:[#allocation4 + $0x1f0] sm:$0xff]  ;;  %v143_v12 = vld [vmem:[#allocation4 + $0xe0] sm:$0xff] }
   0x9   :  { %v146_v10 = vld [vmem:[#allocation4 + $0xf8] sm:$0xff]  ;;  %185 = vmatpush.msra.mxu2 %v145_v8  ;;  %205 = vmatpush.msra.mxu3 %v177_v9  ;;  %v175_v13 = vld [vmem:[#allocation4 + $0x1e0] sm:$0xff]  ;;  %v144_v14 = vld [vmem:[#allocation4 + $0xe8] sm:$0xff] }
   0xa   :  { %87 = vmatpush.msra.mxu0 %v59_v4  ;;  %108 = vmatpush.msra.mxu1 %v58_v7  ;;  %v178_v11 = vld [vmem:[#allocation4 + $0x1f8] sm:$0xff]  ;;  %v176_v15 = vld [vmem:[#allocation4 + $0x1e8] sm:$0xff]  ;;  %v141_v16 = vld [vmem:[#allocation4 + $0xd0] sm:$0xff] }
   0xb   :  { %186 = vmatpush.msra.mxu2 %v143_v12  ;;  %206 = vmatpush.msra.mxu3 %v175_v13  ;;  %v173_v17 = vld [vmem:[#allocation4 + $0x1d0] sm:$0xff]  ;;  %v142_v18 = vld [vmem:[#allocation4 + $0xd8] sm:$0xff]  ;;  %v139_v20 = vld [vmem:[#allocation4 + $0xc0] sm:$0xff] }
   0xc   :  { %88 = vmatpush.msra.mxu0 %v57_v6  ;;  %245 = vmatpush.msrb.mxu1 %v178_v11  ;;  %v174_v19 = vld [vmem:[#allocation4 + $0x1d8] sm:$0xff]  ;;  %v171_v21 = vld [vmem:[#allocation4 + $0x1c0] sm:$0xff]  ;;  %v140_v22 = vld [vmem:[#allocation4 + $0xc8] sm:$0xff] }
   0xd   :  { %187 = vmatpush.msra.mxu2 %v141_v16  ;;  %207 = vmatpush.msra.mxu3 %v173_v17  ;;  %v172_v23 = vld [vmem:[#allocation4 + $0x1c8] sm:$0xff]  ;;  %v137_v24 = vld [vmem:[#allocation4 + $0xb0] sm:$0xff]  ;;  %v138_v26 = vld [vmem:[#allocation4 + $0xb8] sm:$0xff] }
   0xe   :  { %225 = vmatpush.msrb.mxu0 %v146_v10  ;;  %246 = vmatpush.msrb.mxu1 %v176_v15  ;;  %v169_v25 = vld [vmem:[#allocation4 + $0x1b0] sm:$0xff]  ;;  %v170_v27 = vld [vmem:[#allocation4 + $0x1b8] sm:$0xff]  ;;  %v135_v28 = vld [vmem:[#allocation4 + $0xa0] sm:$0xff] }
   0xf   :  { %188 = vmatpush.msra.mxu2 %v139_v20  ;;  %208 = vmatpush.msra.mxu3 %v171_v21  ;;  %v167_v29 = vld [vmem:[#allocation4 + $0x1a0] sm:$0xff]  ;;  %v136_v30 = vld [vmem:[#allocation4 + $0xa8] sm:$0xff]  ;;  %v133_v32 = vld [vmem:[#allocation4 + $0x90] sm:$0xff] }
  0x10   :  { %226 = vmatpush.msrb.mxu0 %v144_v14  ;;  %247 = vmatpush.msrb.mxu1 %v174_v19  ;;  %v168_v31 = vld [vmem:[#allocation4 + $0x1a8] sm:$0xff]  ;;  %v165_v33 = vld [vmem:[#allocation4 + $0x190] sm:$0xff]  ;;  %v134_v34 = vld [vmem:[#allocation4 + $0x98] sm:$0xff] }
  0x11   :  { %189 = vmatpush.msra.mxu2 %v137_v24  ;;  %209 = vmatpush.msra.mxu3 %v169_v25  ;;  %v166_v35 = vld [vmem:[#allocation4 + $0x198] sm:$0xff]  ;;  %v131_v36 = vld [vmem:[#allocation4 + $0x80] sm:$0xff]  ;;  %v132_v38 = vld [vmem:[#allocation4 + $0x88] sm:$0xff] }
  0x12   :  { %227 = vmatpush.msrb.mxu0 %v142_v18  ;;  %248 = vmatpush.msrb.mxu1 %v172_v23  ;;  %v163_v37 = vld [vmem:[#allocation4 + $0x180] sm:$0xff]  ;;  %v164_v39 = vld [vmem:[#allocation4 + $0x188] sm:$0xff]  ;;  %v129_v40 = vld [vmem:[#allocation4 + $0x70] sm:$0xff] }
  0x13   :  { %190 = vmatpush.msra.mxu2 %v135_v28  ;;  %210 = vmatpush.msra.mxu3 %v167_v29  ;;  %v161_v41 = vld [vmem:[#allocation4 + $0x170] sm:$0xff]  ;;  %v130_v42 = vld [vmem:[#allocation4 + $0x78] sm:$0xff]  ;;  %v127_v44 = vld [vmem:[#allocation4 + $0x60] sm:$0xff] }
  0x14   :  { %228 = vmatpush.msrb.mxu0 %v140_v22  ;;  %249 = vmatpush.msrb.mxu1 %v170_v27  ;;  %v162_v43 = vld [vmem:[#allocation4 + $0x178] sm:$0xff]  ;;  %v159_v45 = vld [vmem:[#allocation4 + $0x160] sm:$0xff]  ;;  %v128_v46 = vld [vmem:[#allocation4 + $0x68] sm:$0xff] }
  0x15   :  { %191 = vmatpush.msra.mxu2 %v133_v32  ;;  %211 = vmatpush.msra.mxu3 %v165_v33  ;;  %v160_v47 = vld [vmem:[#allocation4 + $0x168] sm:$0xff]  ;;  %v125_v48 = vld [vmem:[#allocation4 + $0x50] sm:$0xff]  ;;  %v126_v50 = vld [vmem:[#allocation4 + $0x58] sm:$0xff] }
  0x16   :  { %229 = vmatpush.msrb.mxu0 %v138_v26  ;;  %250 = vmatpush.msrb.mxu1 %v168_v31  ;;  %v157_v49 = vld [vmem:[#allocation4 + $0x150] sm:$0xff]  ;;  %v158_v51 = vld [vmem:[#allocation4 + $0x158] sm:$0xff]  ;;  %v123_v52 = vld [vmem:[#allocation4 + $0x40] sm:$0xff] }
  0x17   :  { %192 = vmatpush.msra.mxu2 %v131_v36  ;;  %212 = vmatpush.msra.mxu3 %v163_v37  ;;  %v155_v53 = vld [vmem:[#allocation4 + $0x140] sm:$0xff]  ;;  %v124_v54 = vld [vmem:[#allocation4 + $0x48] sm:$0xff]  ;;  %v121_v56 = vld [vmem:[#allocation4 + $0x30] sm:$0xff] }
  0x18   :  { %230 = vmatpush.msrb.mxu0 %v136_v30  ;;  %251 = vmatpush.msrb.mxu1 %v166_v35  ;;  %v156_v55 = vld [vmem:[#allocation4 + $0x148] sm:$0xff]  ;;  %v153_v57 = vld [vmem:[#allocation4 + $0x130] sm:$0xff]  ;;  %v122_v59 = vld [vmem:[#allocation4 + $0x38] sm:$0xff] }
  0x19   :  { %193 = vmatpush.msra.mxu2 %v129_v40  ;;  %213 = vmatpush.msra.mxu3 %v161_v41  ;;  %v154_v60 = vld [vmem:[#allocation4 + $0x138] sm:$0xff]  ;;  %v119_v62 = vld [vmem:[#allocation4 + $0x20] sm:$0xff]  ;;  %v120_v0 = vld [vmem:[#allocation4 + $0x28] sm:$0xff] }
  0x1a   :  { %231 = vmatpush.msrb.mxu0 %v134_v34  ;;  %252 = vmatpush.msrb.mxu1 %v164_v39  ;;  %v151_v63 = vld [vmem:[#allocation4 + $0x120] sm:$0xff]  ;;  %v152_v1 = vld [vmem:[#allocation4 + $0x128] sm:$0xff]  ;;  %v117_v2 = vld [vmem:[#allocation4 + $0x10] sm:$0xff] }
  0x1b   :  { %194 = vmatpush.msra.mxu2 %v127_v44  ;;  %214 = vmatpush.msra.mxu3 %v159_v45  ;;  %v149_v3 = vld [vmem:[#allocation4 + $0x110] sm:$0xff]  ;;  %v118_v4 = vld [vmem:[#allocation4 + $0x18] sm:$0xff]  ;;  %v115_v6 = vld [vmem:[#allocation4] sm:$0xff] }
  0x1c   :  { %232 = vmatpush.msrb.mxu0 %v132_v38  ;;  %253 = vmatpush.msrb.mxu1 %v162_v43  ;;  %v150_v5 = vld [vmem:[#allocation4 + $0x118] sm:$0xff]  ;;  %v147_v7 = vld [vmem:[#allocation4 + $0x100] sm:$0xff]  ;;  %v116_v8 = vld [vmem:[#allocation4 + $0x8] sm:$0xff] }
  0x1d   :  { %195 = vmatpush.msra.mxu2 %v125_v48  ;;  %215 = vmatpush.msra.mxu3 %v157_v49  ;;  %v148_v9 = vld [vmem:[#allocation4 + $0x108] sm:$0xff]  ;;  %v298_v10 = vld [vmem:[%s605_s6 + $0xf8] sm:$0xff]  ;;  %v296_v14 = vld [vmem:[%s605_s6 + $0xe8] sm:$0xff] }
  0x1e   :  { %233 = vmatpush.msrb.mxu0 %v130_v42  ;;  %254 = vmatpush.msrb.mxu1 %v160_v47  ;;  %v297_v11 = vld [vmem:[%s605_s6 + $0xf0] sm:$0xff]  ;;  %v282_v12 = vld [vmem:[%s605_s6 + $0x78] sm:$0xff]  ;;  %v280_v15 = vld [vmem:[%s605_s6 + $0x68] sm:$0xff] }
  0x1f   :  { %196 = vmatpush.msra.mxu2 %v123_v52  ;;  %216 = vmatpush.msra.mxu3 %v155_v53  ;;  %v281_v13 = vld [vmem:[%s605_s6 + $0x70] sm:$0xff]  ;;  %v295_v16 = vld [vmem:[%s605_s6 + $0xe0] sm:$0xff]  ;;  %v294_v18 = vld [vmem:[%s605_s6 + $0xd8] sm:$0xff] }
  0x20   :  { %234 = vmatpush.msrb.mxu0 %v128_v46  ;;  %255 = vmatpush.msrb.mxu1 %v158_v51  ;;  %v279_v17 = vld [vmem:[%s605_s6 + $0x60] sm:$0xff]  ;;  %v278_v19 = vld [vmem:[%s605_s6 + $0x58] sm:$0xff]  ;;  %v293_v20 = vld [vmem:[%s605_s6 + $0xd0] sm:$0xff] }
  0x21   :  { %197 = vmatpush.msra.mxu2 %v121_v56  ;;  %217 = vmatpush.msra.mxu3 %v153_v57  ;;  %v277_v21 = vld [vmem:[%s605_s6 + $0x50] sm:$0xff]  ;;  %v292_v22 = vld [vmem:[%s605_s6 + $0xc8] sm:$0xff]  ;;  %v291_v24 = vld [vmem:[%s605_s6 + $0xc0] sm:$0xff] }
  0x22   :  { %235 = vmatpush.msrb.mxu0 %v126_v50  ;;  %256 = vmatpush.msrb.mxu1 %v156_v55  ;;  %v276_v23 = vld [vmem:[%s605_s6 + $0x48] sm:$0xff]  ;;  %v275_v25 = vld [vmem:[%s605_s6 + $0x40] sm:$0xff]  ;;  %v290_v26 = vld [vmem:[%s605_s6 + $0xb8] sm:$0xff] }
  0x23   :  { %198 = vmatpush.msra.mxu2 %v119_v62  ;;  %218 = vmatpush.msra.mxu3 %v151_v63  ;;  %v274_v27 = vld [vmem:[%s605_s6 + $0x38] sm:$0xff]  ;;  %v289_v28 = vld [vmem:[%s605_s6 + $0xb0] sm:$0xff]  ;;  %v288_v29 = vld [vmem:[%s605_s6 + $0xa8] sm:$0xff] }
  0x24   :  { %236 = vmatpush.msrb.mxu0 %v124_v54  ;;  %257 = vmatpush.msrb.mxu1 %v154_v60  ;;  %v63_v30 = vld [vmem:[%s602_s3] sm:$0x3]  ;;  %v273_v40 = vld [vmem:[%s605_s6 + $0x30] sm:$0xff]  ;;  %v286_v41 = vld [vmem:[%s605_s6 + $0x98] sm:$0xff] }
  0x25   :  { %199 = vmatpush.msra.mxu2 %v117_v2  ;;  %219 = vmatpush.msra.mxu3 %v149_v3  ;;  %v287_v31 = vld [vmem:[%s605_s6 + $0xa0] sm:$0xff]  ;;  %v65_v32 = vperm.slane %v63_v30, 0  ;;  %v66_v33 = vperm.slane %v63_v30, 1  ;;  %v272_v42 = vld [vmem:[%s605_s6 + $0x28] sm:$0xff]  ;;  %v285_v43 = vld [vmem:[%s605_s6 + $0x90] sm:$0xff] }
  0x26   :  { %237 = vmatpush.msrb.mxu0 %v122_v59  ;;  %258 = vmatpush.msrb.mxu1 %v152_v1  ;;  %v271_v44 = vld [vmem:[%s605_s6 + $0x20] sm:$0xff]  ;;  %v284_v45 = vld [vmem:[%s605_s6 + $0x88] sm:$0xff]  ;;  %v270_v46 = vld [vmem:[%s605_s6 + $0x18] sm:$0xff] }
  0x27   :  { %200 = vmatpush.msra.mxu2 %v115_v6  ;;  %220 = vmatpush.msra.mxu3 %v147_v7  ;;  %v283_v47 = vld [vmem:[%s605_s6 + $0x80] sm:$0xff]  ;;  %v269_v48 = vld [vmem:[%s605_s6 + $0x10] sm:$0xff]  ;;  %v268_v49 = vld [vmem:[%s605_s6 + $0x8] sm:$0xff] }
  0x28   :  { %238 = vmatpush.msrb.mxu0 %v120_v0  ;;  %259 = vmatpush.msrb.mxu1 %v150_v5  ;;  %v267_v50 = vld [vmem:[%s605_s6] sm:$0xff]  ;;  %v300_v0 = vstv %s606_s7 }
  0x29   :  { %321 = vmatpush.msrb.mxu3 %v298_v10  ;;  %301 = vmatpush.msrb.mxu2 %v282_v12  ;;  %v179_v51 = vld [vmem:[%s604_s5] sm:$0x3] }
  0x2a   :  { %239 = vmatpush.msrb.mxu0 %v118_v4  ;;  %260 = vmatpush.msrb.mxu1 %v148_v9  ;;  %v182_v52 = vperm.slane %v179_v51, 1  ;;  %v181_v56 = vperm.slane %v179_v51, 0 }
  0x2b   :  { %322 = vmatpush.msrb.mxu3 %v297_v11  ;;  %302 = vmatpush.msrb.mxu2 %v281_v13 }
  0x2c   :  { %240 = vmatpush.msrb.mxu0 %v116_v8 }
  0x2d   :  { %323 = vmatpush.msrb.mxu3 %v296_v14  ;;  %303 = vmatpush.msrb.mxu2 %v280_v15 }
  0x2f   :  { %324 = vmatpush.msrb.mxu3 %v295_v16  ;;  %304 = vmatpush.msrb.mxu2 %v279_v17 }
  0x31   :  { %325 = vmatpush.msrb.mxu3 %v294_v18  ;;  %305 = vmatpush.msrb.mxu2 %v278_v19 }
  0x33   :  { %326 = vmatpush.msrb.mxu3 %v293_v20  ;;  %306 = vmatpush.msrb.mxu2 %v277_v21 }
  0x35   :  { %327 = vmatpush.msrb.mxu3 %v292_v22  ;;  %307 = vmatpush.msrb.mxu2 %v276_v23 }
  0x37   :  { %328 = vmatpush.msrb.mxu3 %v291_v24  ;;  %308 = vmatpush.msrb.mxu2 %v275_v25 }
  0x39   :  { %329 = vmatpush.msrb.mxu3 %v290_v26  ;;  %309 = vmatpush.msrb.mxu2 %v274_v27 }
  0x3b   :  { %330 = vmatpush.msrb.mxu3 %v289_v28  ;;  %310 = vmatpush.msrb.mxu2 %v273_v40 }
  0x3d   :  { %331 = vmatpush.msrb.mxu3 %v288_v29  ;;  %311 = vmatpush.msrb.mxu2 %v272_v42 }
  0x3f   :  { %332 = vmatpush.msrb.mxu3 %v287_v31  ;;  %312 = vmatpush.msrb.mxu2 %v271_v44 }
  0x41   :  { %333 = vmatpush.msrb.mxu3 %v286_v41  ;;  %313 = vmatpush.msrb.mxu2 %v270_v46 }
  0x43   :  { %334 = vmatpush.msrb.mxu3 %v285_v43  ;;  %314 = vmatpush.msrb.mxu2 %v269_v48 }
  0x45   :  { %335 = vmatpush.msrb.mxu3 %v284_v45  ;;  %315 = vmatpush.msrb.mxu2 %v268_v49 }
  0x47   :  { %336 = vmatpush.msrb.mxu3 %v283_v47  ;;  %316 = vmatpush.msrb.mxu2 %v267_v50 }
  0x78   :  { %v52_v58 = vpop.permute.xlu0 %51 }
  0x79   :  { %55 = vst.msk [vmem:[#allocation2] sm:$0xff] %vm54_vm1, %v52_v58 }
  0x80   :  { %v56_v61 = vld [vmem:[#allocation2] sm:$0xff] }
  0x81   :  { %385 = vmatmul.msk.f32.vlgmr.msra.gmra.mxu0 %vm69_vm2, %v56_v61  ;;  %386 = vmatmul.msk.f32.vlgmr.msra.gmra.mxu1 %vm69_vm2, %v56_v61 }
  0xfe   :  { %v90_v34 = vpop.f32.mrf.mxu0  ;;  %v110_v35 = vpop.f32.mrf.mxu1 }
  0xff   :  { %v91_v36 = vadd.f32 %v90_v34, %v65_v32  ;;  %v111_v37 = vadd.f32 %v110_v35, %v66_v33 }
 0x101   :  { %v113_v38 = vmax.f32 %v91_v36, 0.0  ;;  %v114_v39 = vmax.f32 %v111_v37, 0.0 }
 0x103   :  { %201 = vmatmul.f32.vlgmr.msra.gmra.mxu2 %v113_v38  ;;  %221 = vmatmul.f32.vlgmr.msra.gmra.mxu3 %v114_v39 }
 0x104   :  { %241 = vmatmul.f32.vlgmr.msrb.gmra.mxu0 %v113_v38  ;;  %261 = vmatmul.f32.vlgmr.msrb.gmra.mxu1 %v114_v39 }
 0x181   :  { %v242_v53 = vpop.f32.mrf.mxu0  ;;  %v262_v55 = vpop.f32.mrf.mxu1 }
 0x182   :  { %v243_v54 = vadd.f32 %v242_v53, %v182_v52 }
 0x184   :  { %v263_v57 = vadd.f32 %v262_v55, %v243_v54 }
 0x186   :  { %v266_v58 = vmax.f32 %v263_v57, 0.0  ;;  %v202_v59 = vpop.f32.mrf.mxu2  ;;  %v222_v61 = vpop.f32.mrf.mxu3 }
 0x187   :  { %v203_v60 = vadd.f32 %v202_v59, %v181_v56 }
 0x188   :  { %337 = vmatmul.f32.vlgmr.msrb.gmra.mxu3 %v266_v58 }
 0x189   :  { %v223_v62 = vadd.f32 %v222_v61, %v203_v60 }
 0x18b   :  { %v265_v63 = vmax.f32 %v223_v62, 0.0 }
 0x18d   :  { %317 = vmatmul.f32.vlgmr.msrb.gmra.mxu2 %v265_v63 }
 0x20b   :  { %v338_v3 = vpop.f32.mrf.mxu3 }
 0x210   :  { %v318_v1 = vpop.f32.mrf.mxu2 }
 0x211   :  { %v319_v2 = vadd.f32 %v318_v1, %v300_v0 }
 0x213   :  { %v339_v4 = vadd.f32 %v338_v3, %v319_v2 }
 0x215   :  { %342 = vst.msk [vmem:[#allocation6] sm:$0xff] %vm341_vm3, %v339_v4 }
 0x21c   :  { %v361_v5 = vld [vmem:[#allocation6] sm:$0xf] }
 0x21d   :  { %362 = vst [vmem:[%s607_s8] sm:$0xf] %v361_v5 }
 0x21e   :  { %380 = vsyncpa [#allocation5], 1 }

</bundles_post_ra>
